<compile_context>
chip_gen: v7x
topology: tpu7x:2x2x1
jax: 0.10.0
libtpu: 0.0.40
codegen_flags: <defaults>
</compile_context>

<pallas_src>
import functools

import jax
import jax.numpy as jnp
from jax.experimental import pallas as pl
from jax.experimental.pallas import tpu as pltpu


def _policy_mlp_kernel(w1_ref, b1_ref, w2_ref, b2_ref, x_ref, out_ref):
    """Fused 2->10->1 tanh MLP on one lane-dense batch tile.

    w1_ref : (20,) f32 SMEM  -- fc1.weight.T flattened, w1[i*10 + j]
    b1_ref : (10,) f32 SMEM  -- fc1.bias
    w2_ref : (10,) f32 SMEM  -- fc2.weight flattened
    b2_ref : (1,)  f32 SMEM  -- fc2.bias
    x_ref  : (2, TB) f32 VMEM -- feature-major batch tile
    out_ref: (1, TB) f32 VMEM
    """
    x0 = x_ref[0:1, :]                       # (1, TB)  feature 0 (position)
    x1 = x_ref[1:2, :]                       # (1, TB)  feature 1 (velocity)
    # Seed the accumulator with the output bias (folds the add into the chain).
    acc = jnp.full_like(x0, b2_ref[0])
    for j in range(10):                      # static unroll: 10 hidden units
        h_j = jnp.tanh(w1_ref[j] * x0 + w1_ref[10 + j] * x1 + b1_ref[j])
        acc = acc + w2_ref[j] * h_j
    out_ref[...] = jnp.tanh(acc)


@functools.partial(jax.jit, static_argnames=("block_b",))
def policy_model_forward(x, params, *, block_b=512):
    """Runs the fused Pallas kernel. x: (B, 2) f32. Returns (action_mean (B,1), log_std (1,)).

    Note: a pallas_call has ~1 us of fixed overhead; for tiny batches (a single
    env step) plain XLA would be cheaper -- this kernel pays off for batched
    rollouts (B in the hundreds/thousands).
    """
    w1 = params["w1"].reshape(-1)            # (20,)  fc1.weight.T flattened
    b1 = params["b1"].reshape(-1)            # (10,)
    w2 = params["w2"].reshape(-1)            # (10,)
    b2 = params["b2"].reshape(-1)            # (1,)

    B = x.shape[0]
    # Lane-aligned batch tile; pad the batch up to a whole number of tiles.
    tb = min(block_b, ((B + 127) // 128) * 128)
    b_pad = -(-B // tb) * tb
    x_fm = jnp.pad(x.astype(jnp.float32).T, ((0, 0), (0, b_pad - B)))  # (2, B_pad)

    out_fm = pl.pallas_call(
        _policy_mlp_kernel,
        out_shape=jax.ShapeDtypeStruct((1, b_pad), jnp.float32),
        grid_spec=pltpu.PrefetchScalarGridSpec(
            num_scalar_prefetch=0,
            grid=(b_pad // tb,),
            in_specs=[
                # Parameters: tiny, scalar-read -> keep them resident in SMEM
                # (no per-step padded-VMEM tiles, no extra DMA streams).
                pl.BlockSpec(memory_space=pltpu.MemorySpace.SMEM),   # w1
                pl.BlockSpec(memory_space=pltpu.MemorySpace.SMEM),   # b1
                pl.BlockSpec(memory_space=pltpu.MemorySpace.SMEM),   # w2
                pl.BlockSpec(memory_space=pltpu.MemorySpace.SMEM),   # b2
                # Feature-major batch tile: batch maps to the 128-lane axis.
                pl.BlockSpec((2, tb), lambda i: (0, i)),
            ],
            out_specs=pl.BlockSpec((1, tb), lambda i: (0, i)),
        ),
        compiler_params=pltpu.CompilerParams(
            dimension_semantics=("parallel",),   # shard batch tiles across TCs on v7x
        ),
    )(w1, b1, w2, b2, x_fm)

    action_mean = out_fm[:, :B].T                # back to (B, 1) row-major
    # log_std is a bare parameter returned alongside the network output.
    return action_mean, params["log_std"]


def init_params(key):
    """Deterministic Xavier-normal init with tanh gain (5/3), biases zero."""
    gain = 5.0 / 3.0  # nn.init.calculate_gain('tanh')
    k1, k2 = jax.random.split(key)

    def xavier_normal(k, fan_in, fan_out):
        std = gain * jnp.sqrt(2.0 / (fan_in + fan_out))
        # PyTorch weight shape is (out, in); we store it transposed (in, out).
        return (std * jax.random.normal(k, (fan_in, fan_out))).astype(jnp.float32)

    return {
        "w1": xavier_normal(k1, 2, 10),                  # fc1.weight.T
        "b1": jnp.zeros((1, 10), jnp.float32),           # fc1.bias
        "w2": xavier_normal(k2, 10, 1),                  # fc2.weight.T
        "b2": jnp.zeros((1, 1), jnp.float32),            # fc2.bias
        "log_std": jnp.zeros((1,), jnp.float32),         # nn.Parameter(torch.zeros(1))
    }


if __name__ == "__main__":
    key = jax.random.PRNGKey(0)
    pkey, xkey = jax.random.split(key)

    params = init_params(pkey)
    # MountainCarContinuous observation: 2 features (position, velocity).
    # Modest rollout batch; block_b=256 -> grid of 4 tiles (exercises pipelining).
    B = 1024
    x = jax.random.normal(xkey, (B, 2), dtype=jnp.float32)

    action_mean, log_std = policy_model_forward(x, params, block_b=256)
    jax.block_until_ready((action_mean, log_std))

    assert action_mean.shape == (B, 1)
    assert log_std.shape == (1,)

    # Sanity check vs. pure-JAX reference.
    h_ref = jnp.tanh(x @ params["w1"] + params["b1"])
    out_ref = jnp.tanh(h_ref @ params["w2"] + params["b2"])
    assert jnp.allclose(action_mean, out_ref, atol=1e-4), "mismatch vs reference"

    print("KERNEL_OK")
</pallas_src>

<mosaic_0001>
module attributes {stable_mosaic.version = 11 : i64} {
  func.func @_policy_mlp_kernel(%arg0: i32, %arg1: memref<20xf32, #tpu.memory_space<smem>>, %arg2: memref<10xf32, #tpu.memory_space<smem>>, %arg3: memref<10xf32, #tpu.memory_space<smem>>, %arg4: memref<1xf32, #tpu.memory_space<smem>>, %arg5: memref<2x256xf32, #tpu.memory_space<vmem>>, %arg6: memref<1x256xf32, #tpu.memory_space<vmem>>) attributes {dimension_semantics = [#tpu.dimension_semantics<parallel>], iteration_bounds = array<i64: 4>, scalar_prefetch = 0 : i64, scratch_operands = 0 : i64, tpu.core_type = #tpu.core_type<tc>, window_params = [{transform_indices = @transform_0, window_bounds = array<i64: 20>}, {transform_indices = @transform_1, window_bounds = array<i64: 10>}, {transform_indices = @transform_2, window_bounds = array<i64: 10>}, {transform_indices = @transform_3, window_bounds = array<i64: 1>}, {transform_indices = @transform_4, window_bounds = array<i64: 2, 256>}, {transform_indices = @transform_5, window_bounds = array<i64: 1, 256>}]} {
    %c0 = arith.constant 0 : index
    %c0_0 = arith.constant 0 : index
    %0 = vector.load %arg5[%c0, %c0_0] : memref<2x256xf32, #tpu.memory_space<vmem>>, vector<1x256xf32>
    %c1 = arith.constant 1 : index
    %c0_1 = arith.constant 0 : index
    %1 = vector.load %arg5[%c1, %c0_1] : memref<2x256xf32, #tpu.memory_space<vmem>>, vector<1x256xf32>
    %c0_2 = arith.constant 0 : index
    %2 = memref.load %arg4[%c0_2] : memref<1xf32, #tpu.memory_space<smem>>
    %3 = vector.broadcast %2 : f32 to vector<1x256xf32>
    %c0_3 = arith.constant 0 : index
    %4 = memref.load %arg1[%c0_3] : memref<20xf32, #tpu.memory_space<smem>>
    %5 = vector.broadcast %4 : f32 to vector<1x256xf32>
    %6 = arith.mulf %5, %0 : vector<1x256xf32>
    %c10 = arith.constant 10 : index
    %7 = memref.load %arg1[%c10] : memref<20xf32, #tpu.memory_space<smem>>
    %8 = vector.broadcast %7 : f32 to vector<1x256xf32>
    %9 = arith.mulf %8, %1 : vector<1x256xf32>
    %10 = arith.addf %6, %9 : vector<1x256xf32>
    %c0_4 = arith.constant 0 : index
    %11 = memref.load %arg2[%c0_4] : memref<10xf32, #tpu.memory_space<smem>>
    %12 = vector.broadcast %11 : f32 to vector<1x256xf32>
    %13 = arith.addf %10, %12 : vector<1x256xf32>
    %14 = math.tanh %13 : vector<1x256xf32>
    %c0_5 = arith.constant 0 : index
    %15 = memref.load %arg3[%c0_5] : memref<10xf32, #tpu.memory_space<smem>>
    %16 = vector.broadcast %15 : f32 to vector<1x256xf32>
    %17 = arith.mulf %16, %14 : vector<1x256xf32>
    %18 = arith.addf %3, %17 : vector<1x256xf32>
    %c1_6 = arith.constant 1 : index
    %19 = memref.load %arg1[%c1_6] : memref<20xf32, #tpu.memory_space<smem>>
    %20 = vector.broadcast %19 : f32 to vector<1x256xf32>
    %21 = arith.mulf %20, %0 : vector<1x256xf32>
    %c11 = arith.constant 11 : index
    %22 = memref.load %arg1[%c11] : memref<20xf32, #tpu.memory_space<smem>>
    %23 = vector.broadcast %22 : f32 to vector<1x256xf32>
    %24 = arith.mulf %23, %1 : vector<1x256xf32>
    %25 = arith.addf %21, %24 : vector<1x256xf32>
    %c1_7 = arith.constant 1 : index
    %26 = memref.load %arg2[%c1_7] : memref<10xf32, #tpu.memory_space<smem>>
    %27 = vector.broadcast %26 : f32 to vector<1x256xf32>
    %28 = arith.addf %25, %27 : vector<1x256xf32>
    %29 = math.tanh %28 : vector<1x256xf32>
    %c1_8 = arith.constant 1 : index
    %30 = memref.load %arg3[%c1_8] : memref<10xf32, #tpu.memory_space<smem>>
    %31 = vector.broadcast %30 : f32 to vector<1x256xf32>
    %32 = arith.mulf %31, %29 : vector<1x256xf32>
    %33 = arith.addf %18, %32 : vector<1x256xf32>
    %c2 = arith.constant 2 : index
    %34 = memref.load %arg1[%c2] : memref<20xf32, #tpu.memory_space<smem>>
    %35 = vector.broadcast %34 : f32 to vector<1x256xf32>
    %36 = arith.mulf %35, %0 : vector<1x256xf32>
    %c12 = arith.constant 12 : index
    %37 = memref.load %arg1[%c12] : memref<20xf32, #tpu.memory_space<smem>>
    %38 = vector.broadcast %37 : f32 to vector<1x256xf32>
    %39 = arith.mulf %38, %1 : vector<1x256xf32>
    %40 = arith.addf %36, %39 : vector<1x256xf32>
    %c2_9 = arith.constant 2 : index
    %41 = memref.load %arg2[%c2_9] : memref<10xf32, #tpu.memory_space<smem>>
    %42 = vector.broadcast %41 : f32 to vector<1x256xf32>
    %43 = arith.addf %40, %42 : vector<1x256xf32>
    %44 = math.tanh %43 : vector<1x256xf32>
    %c2_10 = arith.constant 2 : index
    %45 = memref.load %arg3[%c2_10] : memref<10xf32, #tpu.memory_space<smem>>
    %46 = vector.broadcast %45 : f32 to vector<1x256xf32>
    %47 = arith.mulf %46, %44 : vector<1x256xf32>
    %48 = arith.addf %33, %47 : vector<1x256xf32>
    %c3 = arith.constant 3 : index
    %49 = memref.load %arg1[%c3] : memref<20xf32, #tpu.memory_space<smem>>
    %50 = vector.broadcast %49 : f32 to vector<1x256xf32>
    %51 = arith.mulf %50, %0 : vector<1x256xf32>
    %c13 = arith.constant 13 : index
    %52 = memref.load %arg1[%c13] : memref<20xf32, #tpu.memory_space<smem>>
    %53 = vector.broadcast %52 : f32 to vector<1x256xf32>
    %54 = arith.mulf %53, %1 : vector<1x256xf32>
    %55 = arith.addf %51, %54 : vector<1x256xf32>
    %c3_11 = arith.constant 3 : index
    %56 = memref.load %arg2[%c3_11] : memref<10xf32, #tpu.memory_space<smem>>
    %57 = vector.broadcast %56 : f32 to vector<1x256xf32>
    %58 = arith.addf %55, %57 : vector<1x256xf32>
    %59 = math.tanh %58 : vector<1x256xf32>
    %c3_12 = arith.constant 3 : index
    %60 = memref.load %arg3[%c3_12] : memref<10xf32, #tpu.memory_space<smem>>
    %61 = vector.broadcast %60 : f32 to vector<1x256xf32>
    %62 = arith.mulf %61, %59 : vector<1x256xf32>
    %63 = arith.addf %48, %62 : vector<1x256xf32>
    %c4 = arith.constant 4 : index
    %64 = memref.load %arg1[%c4] : memref<20xf32, #tpu.memory_space<smem>>
    %65 = vector.broadcast %64 : f32 to vector<1x256xf32>
    %66 = arith.mulf %65, %0 : vector<1x256xf32>
    %c14 = arith.constant 14 : index
    %67 = memref.load %arg1[%c14] : memref<20xf32, #tpu.memory_space<smem>>
    %68 = vector.broadcast %67 : f32 to vector<1x256xf32>
    %69 = arith.mulf %68, %1 : vector<1x256xf32>
    %70 = arith.addf %66, %69 : vector<1x256xf32>
    %c4_13 = arith.constant 4 : index
    %71 = memref.load %arg2[%c4_13] : memref<10xf32, #tpu.memory_space<smem>>
    %72 = vector.broadcast %71 : f32 to vector<1x256xf32>
    %73 = arith.addf %70, %72 : vector<1x256xf32>
    %74 = math.tanh %73 : vector<1x256xf32>
    %c4_14 = arith.constant 4 : index
    %75 = memref.load %arg3[%c4_14] : memref<10xf32, #tpu.memory_space<smem>>
    %76 = vector.broadcast %75 : f32 to vector<1x256xf32>
    %77 = arith.mulf %76, %74 : vector<1x256xf32>
    %78 = arith.addf %63, %77 : vector<1x256xf32>
    %c5 = arith.constant 5 : index
    %79 = memref.load %arg1[%c5] : memref<20xf32, #tpu.memory_space<smem>>
    %80 = vector.broadcast %79 : f32 to vector<1x256xf32>
    %81 = arith.mulf %80, %0 : vector<1x256xf32>
    %c15 = arith.constant 15 : index
    %82 = memref.load %arg1[%c15] : memref<20xf32, #tpu.memory_space<smem>>
    %83 = vector.broadcast %82 : f32 to vector<1x256xf32>
    %84 = arith.mulf %83, %1 : vector<1x256xf32>
    %85 = arith.addf %81, %84 : vector<1x256xf32>
    %c5_15 = arith.constant 5 : index
    %86 = memref.load %arg2[%c5_15] : memref<10xf32, #tpu.memory_space<smem>>
    %87 = vector.broadcast %86 : f32 to vector<1x256xf32>
    %88 = arith.addf %85, %87 : vector<1x256xf32>
    %89 = math.tanh %88 : vector<1x256xf32>
    %c5_16 = arith.constant 5 : index
    %90 = memref.load %arg3[%c5_16] : memref<10xf32, #tpu.memory_space<smem>>
    %91 = vector.broadcast %90 : f32 to vector<1x256xf32>
    %92 = arith.mulf %91, %89 : vector<1x256xf32>
    %93 = arith.addf %78, %92 : vector<1x256xf32>
    %c6 = arith.constant 6 : index
    %94 = memref.load %arg1[%c6] : memref<20xf32, #tpu.memory_space<smem>>
    %95 = vector.broadcast %94 : f32 to vector<1x256xf32>
    %96 = arith.mulf %95, %0 : vector<1x256xf32>
    %c16 = arith.constant 16 : index
    %97 = memref.load %arg1[%c16] : memref<20xf32, #tpu.memory_space<smem>>
    %98 = vector.broadcast %97 : f32 to vector<1x256xf32>
    %99 = arith.mulf %98, %1 : vector<1x256xf32>
    %100 = arith.addf %96, %99 : vector<1x256xf32>
    %c6_17 = arith.constant 6 : index
    %101 = memref.load %arg2[%c6_17] : memref<10xf32, #tpu.memory_space<smem>>
    %102 = vector.broadcast %101 : f32 to vector<1x256xf32>
    %103 = arith.addf %100, %102 : vector<1x256xf32>
    %104 = math.tanh %103 : vector<1x256xf32>
    %c6_18 = arith.constant 6 : index
    %105 = memref.load %arg3[%c6_18] : memref<10xf32, #tpu.memory_space<smem>>
    %106 = vector.broadcast %105 : f32 to vector<1x256xf32>
    %107 = arith.mulf %106, %104 : vector<1x256xf32>
    %108 = arith.addf %93, %107 : vector<1x256xf32>
    %c7 = arith.constant 7 : index
    %109 = memref.load %arg1[%c7] : memref<20xf32, #tpu.memory_space<smem>>
    %110 = vector.broadcast %109 : f32 to vector<1x256xf32>
    %111 = arith.mulf %110, %0 : vector<1x256xf32>
    %c17 = arith.constant 17 : index
    %112 = memref.load %arg1[%c17] : memref<20xf32, #tpu.memory_space<smem>>
    %113 = vector.broadcast %112 : f32 to vector<1x256xf32>
    %114 = arith.mulf %113, %1 : vector<1x256xf32>
    %115 = arith.addf %111, %114 : vector<1x256xf32>
    %c7_19 = arith.constant 7 : index
    %116 = memref.load %arg2[%c7_19] : memref<10xf32, #tpu.memory_space<smem>>
    %117 = vector.broadcast %116 : f32 to vector<1x256xf32>
    %118 = arith.addf %115, %117 : vector<1x256xf32>
    %119 = math.tanh %118 : vector<1x256xf32>
    %c7_20 = arith.constant 7 : index
    %120 = memref.load %arg3[%c7_20] : memref<10xf32, #tpu.memory_space<smem>>
    %121 = vector.broadcast %120 : f32 to vector<1x256xf32>
    %122 = arith.mulf %121, %119 : vector<1x256xf32>
    %123 = arith.addf %108, %122 : vector<1x256xf32>
    %c8 = arith.constant 8 : index
    %124 = memref.load %arg1[%c8] : memref<20xf32, #tpu.memory_space<smem>>
    %125 = vector.broadcast %124 : f32 to vector<1x256xf32>
    %126 = arith.mulf %125, %0 : vector<1x256xf32>
    %c18 = arith.constant 18 : index
    %127 = memref.load %arg1[%c18] : memref<20xf32, #tpu.memory_space<smem>>
    %128 = vector.broadcast %127 : f32 to vector<1x256xf32>
    %129 = arith.mulf %128, %1 : vector<1x256xf32>
    %130 = arith.addf %126, %129 : vector<1x256xf32>
    %c8_21 = arith.constant 8 : index
    %131 = memref.load %arg2[%c8_21] : memref<10xf32, #tpu.memory_space<smem>>
    %132 = vector.broadcast %131 : f32 to vector<1x256xf32>
    %133 = arith.addf %130, %132 : vector<1x256xf32>
    %134 = math.tanh %133 : vector<1x256xf32>
    %c8_22 = arith.constant 8 : index
    %135 = memref.load %arg3[%c8_22] : memref<10xf32, #tpu.memory_space<smem>>
    %136 = vector.broadcast %135 : f32 to vector<1x256xf32>
    %137 = arith.mulf %136, %134 : vector<1x256xf32>
    %138 = arith.addf %123, %137 : vector<1x256xf32>
    %c9 = arith.constant 9 : index
    %139 = memref.load %arg1[%c9] : memref<20xf32, #tpu.memory_space<smem>>
    %140 = vector.broadcast %139 : f32 to vector<1x256xf32>
    %141 = arith.mulf %140, %0 : vector<1x256xf32>
    %c19 = arith.constant 19 : index
    %142 = memref.load %arg1[%c19] : memref<20xf32, #tpu.memory_space<smem>>
    %143 = vector.broadcast %142 : f32 to vector<1x256xf32>
    %144 = arith.mulf %143, %1 : vector<1x256xf32>
    %145 = arith.addf %141, %144 : vector<1x256xf32>
    %c9_23 = arith.constant 9 : index
    %146 = memref.load %arg2[%c9_23] : memref<10xf32, #tpu.memory_space<smem>>
    %147 = vector.broadcast %146 : f32 to vector<1x256xf32>
    %148 = arith.addf %145, %147 : vector<1x256xf32>
    %149 = math.tanh %148 : vector<1x256xf32>
    %c9_24 = arith.constant 9 : index
    %150 = memref.load %arg3[%c9_24] : memref<10xf32, #tpu.memory_space<smem>>
    %151 = vector.broadcast %150 : f32 to vector<1x256xf32>
    %152 = arith.mulf %151, %149 : vector<1x256xf32>
    %153 = arith.addf %138, %152 : vector<1x256xf32>
    %154 = math.tanh %153 : vector<1x256xf32>
    %c0_25 = arith.constant 0 : index
    %c0_26 = arith.constant 0 : index
    %155 = vector.load %arg6[%c0_25, %c0_26] : memref<1x256xf32, #tpu.memory_space<vmem>>, vector<1x256xf32>
    tpu.vector_store %arg6[%c0_25, %c0_26], %154 {strides = array<i32>} : memref<1x256xf32, #tpu.memory_space<vmem>>, vector<1x256xf32>,
    return
  }
  func.func @transform_0(%arg0: i32) -> i32 {
    %c0_i32 = arith.constant 0 : i32
    %c0_i32_0 = arith.constant 0 : i32
    return %c0_i32 : i32
  }
  func.func @transform_1(%arg0: i32) -> i32 {
    %c0_i32 = arith.constant 0 : i32
    %c0_i32_0 = arith.constant 0 : i32
    return %c0_i32 : i32
  }
  func.func @transform_2(%arg0: i32) -> i32 {
    %c0_i32 = arith.constant 0 : i32
    %c0_i32_0 = arith.constant 0 : i32
    return %c0_i32 : i32
  }
  func.func @transform_3(%arg0: i32) -> i32 {
    %c0_i32 = arith.constant 0 : i32
    %c0_i32_0 = arith.constant 0 : i32
    return %c0_i32 : i32
  }
  func.func @transform_4(%arg0: i32) -> (i32, i32) {
    %c0_i32 = arith.constant 0 : i32
    %c0_i32_0 = arith.constant 0 : i32
    return %c0_i32, %arg0 : i32, i32
  }
  func.func @transform_5(%arg0: i32) -> (i32, i32) {
    %c0_i32 = arith.constant 0 : i32
    %c0_i32_0 = arith.constant 0 : i32
    return %c0_i32, %arg0 : i32, i32
  }
}

</mosaic_0001>

<bundles_post_ra>
// kernel: policy_model_forward.1
= control target key start
LH: loop header
LB: loop body
LE: loop exit
PB: predicated region body
PF: predicated region fallthrough
CT: control target
= control target key end

     0   :  { %s1107_s0 = inlined_call_operand.vmem [shape: f32[20], index: 0, kind: input, shape index: {}]   ;;  %s1108_s1 = inlined_call_operand.vmem [shape: f32[10], index: 1, kind: input, shape index: {}]   ;;  %s1109_s2 = inlined_call_operand.vmem [shape: f32[10], index: 2, kind: input, shape index: {}]   ;;  %s1110_s3 = inlined_call_operand.<no memory space> [shape: f32[1], index: 3, kind: input, shape index: {}]   ;;  %s1111_s4 = inlined_call_operand.vmem [shape: f32[2,1024], index: 4, kind: input, shape index: {}]   ;;  %s1112_s5 = inlined_call_operand.hbm [shape: f32[1,1024], index: 5, kind: output, shape index: {}]  }
   0x1   :  { %10 = sst [smem:[#allocation2]] %s1110_s3 }
   0x2   :  { %11 = vsyncpa [#allocation5], 0 }
   0x3   :  { %12 = vsyncpa [#allocation7], 0 }
   0x4   :  { %13 = vsyncpa [#allocation4], 0 }
   0x5   :  { %15 = vsyncpa [#allocation4 + $0x1], 0  ;;  %s835_s20 = smov 0   ;;  %s837_s21 = smov 0  }
   0x6   :  { %s839_s22 = smov 0   ;;  %s841_s23 = smov 0  }
   0x7 LB: > { %s856_s3 = sadd.s32 4294967295, %s796_s23   ;;  %s532_s24 = sadd.s32 4294967294, %s796_s23   ;;  %s796_s23 = sphi %s841_s23, %s1130_s23   ;;  %s792_s22 = sphi %s839_s22, %s1129_s22   ;;  %s788_s21 = sphi %s837_s21, %s1128_s21   ;;  %s784_s20 = sphi %s835_s20, %s1127_s20  }
   0x8   : > { %s860_s25 = sadd.s32 1, %s796_s23   ;;  %s138_s26 = sadd.s32 1, %s792_s22 }
   0x9   : > { %s135_s27 = ssub.s32 %s796_s23, %s860_s25  ;;  %p148_p0 = scmp.ne.s32.totalorder %s792_s22, %s788_s21 }
   0xa   : > { %p136_p1 = scmp.eq.s32.totalorder %s135_s27, 0  ;;  %p149_p2 = scmp.eq.s32.totalorder %s856_s3, 3 }
   0xb   : > { %p154_p3 = scmp.ne.s32.totalorder %s788_s21, %s784_s20  ;;  %p155_p4 = scmp.eq.s32.totalorder %s532_s24, 3 }
   0xc   : > { %s871_s28 = scalar_select %p136_p1, %s792_s22, %s138_s26  }
   0xd   : > { %p873_p5 = por %p149_p2, %p148_p0  ;;  %p877_p6 = por %p155_p4, %p154_p3 }
   0xe   : > { %p533_p7 = scmp.ge.s32.totalorder %s796_s23, 1  ;;  %p162_p8 = scmp.lt.s32.totalorder %s796_s23, 5 }
   0xf   : > { %s1116_s29 = scalar_select %p873_p5, 1, 0 }
  0x10   : > { %s1117_s30 = scalar_select %p877_p6, 1, 0 }
  0x11   : > { %p1113_p9 = scmp.eq.s32.totalorder %s856_s3, 0  ;;  %p884_p10 = pnand %p533_p7, %p162_p8 }
  0x12   : > { %s186_s9 = sshll.u32 %s1108_s1, 4  ;;  %s175_s12 = sshll.u32 %s1107_s0, 4  ;;  %s187_s9 = int_to_ptr.vmem [resolvable:$true] %s186_s9  ;;  %s176_s12 = int_to_ptr.vmem [resolvable:$true] %s175_s12 }
  0x13   : > { %s1118_s6 = scalar_select %p884_p10, 1, 0 }
  0x14   : > { %p603_p11 = pneg %p884_p10  ;;  %s197_s16 = sshll.u32 %s1109_s2, 4  ;;  %s905_s16 = int_to_ptr.vmem [resolvable:$true] %s197_s16 }
  0x15   : > { %s681_s17 = scalar_lea.vmem %s187_s9, 16  ;;  %p689_p3 = scmp.lt.s32.totalorder %s187_s9, %s187_s9 }
  0x16   : > { %p898_p12 = pnand %p1113_p9, %p603_p11  ;;  %p682_p13 = scmp.ne.s32.totalorder %s187_s9, %s681_s17 }
  0x17   : > { %p690_p4 = scmp.lt.s32.totalorder %s681_s17, %s681_s17 }
  0x18   : > { %p683_p0 = pneg %p898_p12 }
  0x19   : > { %p691_p7 = por %p690_p4, %p689_p3 }
  0x1a   : > { %p684_p1 = pnand %p683_p0, %p682_p13 }
  0x1c   : > { %p685_p2 = pneg %p684_p1 }
  0x1e   : > { %p692_p8 = pnand %p691_p7, %p685_p2 }
  0x20   : > { %695 = shalt.err (!%p692_p8)
}
  0x21   : > { %s798_s18 = smov [#allocation6]   ;;  %s696_s19 = scalar_lea.vmem %s176_s12, 16 }
  0x22   : > { %609 = dma.vmem_to_smem (!%p898_p12), %s187_s9, 16, %s798_s18, [#allocation7]  }
  0x23   : > { %p697_p11 = scmp.ne.s32.totalorder %s176_s12, %s696_s19  ;;  %p704_p5 = scmp.lt.s32.totalorder %s176_s12, %s176_s12 }
  0x24   : > { %p705_p10 = scmp.lt.s32.totalorder %s696_s19, %s696_s19 }
  0x25   : > { %p699_p9 = pnand %p697_p11, %p683_p0 }
  0x26   : > { %p706_p13 = por %p705_p10, %p704_p5 }
  0x27   : > { %p700_p6 = pneg %p699_p9 }
  0x29   : > { %p707_p1 = pnand %p706_p13, %p700_p6 }
  0x2b   : > { %710 = shalt.err (!%p707_p1)
}
  0x2c   : > { %s799_s24 = smov [#allocation3]   ;;  %s711_s26 = scalar_lea.vmem %s905_s16, 16 }
  0x2d   : > { %606 = dma.vmem_to_smem (!%p898_p12), %s176_s12, 16, %s799_s24, [#allocation5]  }
  0x2e   : > { %p712_p2 = scmp.ne.s32.totalorder %s905_s16, %s711_s26  ;;  %p719_p9 = scmp.lt.s32.totalorder %s905_s16, %s905_s16 }
  0x2f   : > { %p720_p7 = scmp.lt.s32.totalorder %s711_s26, %s711_s26 }
  0x30   : > { %p714_p3 = pnand %p712_p2, %p683_p0 }
  0x31   : > { %p721_p5 = por %p720_p7, %p719_p9 }
  0x32   : > { %p715_p4 = pneg %p714_p3 }
  0x34   : > { %p722_p6 = pnand %p721_p5, %p715_p4 }
  0x36   : > { %725 = shalt.err (!%p722_p6)
}
  0x37   : > { %s800_s27 = smov [#allocation8]   ;;  %p1120_p10 = scmp.ne.s32.totalorder %s1118_s6, 0 }
  0x38   : > { %612 = dma.vmem_to_smem (!%p898_p12), %s905_s16, 16, %s800_s27, [#allocation7]  }
  0x39   : > { %222 = sbr.rel (%p1120_p10) target bundleno = 147 (0x93), region = 40  ;;  %p1121_p8 = scmp.eq.s32.totalorder (!%p1120_p10), %s856_s3, 0 }
  0x40   : > { %771 = dma.done.wait (%p1121_p8), [#allocation5], 16   ;;  %p1122_p0 = pmov %p1121_p8 }
  0x42   : > { %773 = vsyncadd (%p1122_p0), [#allocation5], 4294967280  ;;  %p1123_p11 = pmov %p1122_p0 }
  0x43   : > { %p1124_p13 = pmov %p1122_p0 }
  0x44   : > { %775 = dma.done.wait (%p1123_p11), [#allocation7], 32  }
  0x45   : > { %777 = vsyncadd (%p1124_p13), [#allocation7], 4294967264 }
  0x46   : > { %236 = sfence }
  0x47   : > { %s543_s7 = sshll.u32 %s856_s3, 1  ;;  %s271_s8 = sld [smem:[#allocation3]] }
  0x48   : > { %p260_p1 = scmp.lt.s32.totalorder %s543_s7, 7  ;;  %s546_s6 = sld [smem:[#allocation3 + $0xa]] }
  0x49   : > { %s278_s10 = sld [smem:[#allocation6]]  ;;  %s547_s14 = sld [smem:[#allocation3 + $0x1]] }
  0x4a   : > { %s1132_s7 = smov (!%p260_p1, %s543_s7), 7  ;;  %s548_s15 = sld [smem:[#allocation3 + $0xb]] }
  0x4b   : > { %s544_s9 = sshll.u32 %s1132_s7, 1  ;;  %s947_s16 = sld [smem:[#allocation6 + $0x1]] }
  0x4c   : > { %s263_s13 = scalar_lea.vmem %s1111_s4, %s544_s9  ;;  %s551_s17 = sld [smem:[#allocation3 + $0x2]] }
  0x4d   : > { %v943_v0 = vld [vmem:[%s263_s13] ss:$2 sm:$0x3]  ;;  %v945_v1 = vld [vmem:[%s263_s13 + $0x1] ss:$2 sm:$0x3]  ;;  %v272_v2 = vstv %s271_s8 }
  0x4e   : > { %v275_v3 = vstv %s546_s6  ;;  %s552_s18 = sld [smem:[#allocation3 + $0xc]]  ;;  %v273_v4 = vmul.f32 %v272_v2, %v943_v0  ;;  %s951_s19 = sld [smem:[#allocation6 + $0x2]] }
  0x4f   : > { %v276_v5 = vmul.f32 %v945_v1, %v275_v3  ;;  %v279_v6 = vstv %s278_s10  ;;  %s953_s24 = sld [smem:[#allocation3 + $0x3]]  ;;  %s955_s26 = sld [smem:[#allocation3 + $0xd]]  ;;  %v287_v8 = vstv %s547_s14 }
  0x50   : > { %s957_s27 = sld [smem:[#allocation2]]  ;;  %s959_s7 = sld [smem:[#allocation6 + $0x3]]  ;;  %v290_v9 = vstv %s548_s15  ;;  %v288_v11 = vmul.f32 %v287_v8, %v943_v0 }
  0x51   : > { %v277_v7 = vadd.f32 %v276_v5, %v273_v4  ;;  %s961_s8 = sld [smem:[#allocation3 + $0x4]]  ;;  %s963_s6 = sld [smem:[#allocation3 + $0xe]]  ;;  %v291_v12 = vmul.f32 %v945_v1, %v290_v9  ;;  %v294_v13 = vstv %s947_s16 }
  0x52   : > { %s965_s9 = sld [smem:[#allocation8]]  ;;  %s969_s10 = sld [smem:[#allocation6 + $0x4]]  ;;  %v302_v14 = vstv %s551_s17 }
  0x53   : > { %v280_v10 = vadd.f32 %v279_v6, %v277_v7  ;;  %s972_s11 = sld [smem:[#allocation3 + $0x5]]  ;;  %s974_s12 = sld [smem:[#allocation3 + $0xf]]  ;;  %v292_v16 = vadd.f32 %v291_v12, %v288_v11  ;;  %v303_v17 = vmul.f32 %v302_v14, %v943_v0 }
  0x54   : > { %v305_v15 = vstv %s552_s18  ;;  %s978_s13 = sld [smem:[#allocation6 + $0x5]]  ;;  %v309_v19 = vstv %s951_s19  ;;  %s983_s14 = sld [smem:[#allocation3 + $0x6]] }
  0x55   : > { %659 = vtanh.f32 %v280_v10  ;;  %v306_v18 = vmul.f32 %v945_v1, %v305_v15  ;;  %v317_v20 = vstv %s953_s24  ;;  %v320_v21 = vstv %s955_s26  ;;  %s985_s15 = sld [smem:[#allocation3 + $0x10]]  ;;  %s987_s16 = sld [smem:[#allocation8 + $0x1]] }
  0x56   : > { %v295_v22 = vadd.f32 %v294_v13, %v292_v16  ;;  %v318_v24 = vmul.f32 %v317_v20, %v943_v0  ;;  %v321_v25 = vmul.f32 %v945_v1, %v320_v21  ;;  %s991_s17 = sld [smem:[#allocation6 + $0x6]]  ;;  %v324_v26 = vstv %s959_s7  ;;  %s996_s18 = sld [smem:[#allocation3 + $0x7]] }
  0x57   : > { %v307_v23 = vadd.f32 %v306_v18, %v303_v17  ;;  %v332_v27 = vstv %s961_s8  ;;  %v335_v28 = vstv %s963_s6  ;;  %s998_s19 = sld [smem:[#allocation3 + $0x11]]  ;;  %s1001_s24 = sld [smem:[#allocation6 + $0x7]]  ;;  %v270_v38 = vstv %s957_s27 }
  0x58   : > { %661 = vtanh.f32 %v295_v22  ;;  %v322_v30 = vadd.f32 %v321_v25, %v318_v24  ;;  %v333_v31 = vmul.f32 %v332_v27, %v943_v0  ;;  %s1003_s26 = sld [smem:[#allocation8 + $0x2]]  ;;  %v336_v32 = vmul.f32 %v945_v1, %v335_v28  ;;  %s1008_s7 = sld [smem:[#allocation3 + $0x8]] }
  0x59   : > { %v310_v29 = vadd.f32 %v309_v19, %v307_v23  ;;  %v339_v33 = vstv %s969_s10  ;;  %v347_v34 = vstv %s972_s11  ;;  %s1010_s8 = sld [smem:[#allocation8 + $0x3]]  ;;  %v350_v37 = vstv %s974_s12  ;;  %s1014_s6 = sld [smem:[#allocation3 + $0x12]] }
  0x5a   : > { %v325_v35 = vadd.f32 %v324_v26, %v322_v30  ;;  %v348_v36 = vmul.f32 %v347_v34, %v943_v0  ;;  %v283_v39 = vstv %s965_s9  ;;  %v337_v40 = vadd.f32 %v336_v32, %v333_v31  ;;  %s1019_s10 = sld [smem:[#allocation3 + $0x9]]  ;;  %s1024_s11 = sld [smem:[#allocation6 + $0x8]] }
  0x5b   : > { %663 = vtanh.f32 %v310_v29  ;;  %v351_v41 = vmul.f32 %v945_v1, %v350_v37  ;;  %v354_v42 = vstv %s978_s13  ;;  %v362_v43 = vstv %s983_s14  ;;  %s1026_s12 = sld [smem:[#allocation3 + $0x13]]  ;;  %s1031_s27 = sld [smem:[#allocation8 + $0x4]] }
  0x5c   : > { %665 = vtanh.f32 %v325_v35  ;;  %v365_v44 = vstv %s985_s15  ;;  %v340_v45 = vadd.f32 %v339_v33, %v337_v40  ;;  %v363_v47 = vmul.f32 %v362_v43, %v943_v0  ;;  %s1036_s9 = sld [smem:[#allocation6 + $0x9]]  ;;  %s1042_s13 = sld [smem:[#allocation8 + $0x5]] }
  0x5d   : > { %v352_v46 = vadd.f32 %v351_v41, %v348_v36  ;;  %v366_v48 = vmul.f32 %v945_v1, %v365_v44  ;;  %v298_v50 = vstv %s987_s16  ;;  %v369_v51 = vstv %s991_s17  ;;  %s1048_s14 = sld [smem:[#allocation8 + $0x6]]  ;;  %s574_s15 = sld [smem:[#allocation8 + $0x7]] }
  0x5e   : > { %v377_v52 = vstv %s996_s18  ;;  %v380_v53 = vstv %s998_s19  ;;  %667 = vtanh.f32 %v340_v45  ;;  %v384_v59 = vstv %s1001_s24  ;;  %s578_s16 = sld [smem:[#allocation8 + $0x8]]  ;;  %s582_s17 = sld [smem:[#allocation8 + $0x9]] }
  0x5f   : > { %v660_v49 = vpop.eup %659  ;;  %v355_v55 = vadd.f32 %v354_v42, %v352_v46  ;;  %v367_v56 = vadd.f32 %v366_v48, %v363_v47  ;;  %v378_v57 = vmul.f32 %v377_v52, %v943_v0  ;;  %v381_v58 = vmul.f32 %v945_v1, %v380_v53  ;;  %s256_s18 = sand.u32 1, %s788_s21   ;;  %s588_s24 = sshll.u32 %s856_s3, 5 }
  0x60   : > { %v284_v54 = vmul.f32 %v660_v49, %v283_v39  ;;  %v392_v60 = vstv %s1008_s7  ;;  %v313_v3 = vstv %s1003_s26  ;;  %v328_v4 = vstv %s1010_s8  ;;  %s542_s19 = sshll.u32 %s256_s18, 1  ;;  %p1125_p2 = scmp.ne.s32.totalorder %s1116_s29, 0 }
  0x61   : > { %669 = vtanh.f32 %v355_v55  ;;  %v370_v62 = vadd.f32 %v369_v51, %v367_v56  ;;  %v393_v63 = vmul.f32 %v392_v60, %v943_v0  ;;  %v382_v5 = vadd.f32 %v381_v58, %v378_v57  ;;  %s258_s26 = scalar_lea.vmem [#allocation9], %s542_s19  ;;  %s801_s3 = smov [#allocation9]  }
  0x62   : > { %v285_v61 = vadd.f32 %v284_v54, %v270_v38  ;;  %v662_v2 = vpop.eup %661  ;;  %v395_v6 = vstv %s1014_s6  ;;  %v407_v9 = vstv %s1019_s10  ;;  %v399_v12 = vstv %s1024_s11  ;;  %s442_s7 = sshll.u32 %s258_s26, 4  ;;  %s1065_s10 = scalar_lea.hbm %s1112_s5, %s588_s24  ;;  %s1067_s7 = int_to_ptr.vmem [resolvable:$true] %s442_s7 }
  0x63   : > { %v299_v7 = vmul.f32 %v662_v2, %v298_v50  ;;  %671 = vtanh.f32 %v370_v62  ;;  %v396_v8 = vmul.f32 %v945_v1, %v395_v6  ;;  %v385_v11 = vadd.f32 %v384_v59, %v382_v5  ;;  %s428_s11 = scalar_lea.sflag [#allocation4], %s256_s18 }
  0x64   : > { %v408_v13 = vmul.f32 %v407_v9, %v943_v0  ;;  %v410_v14 = vstv %s1026_s12  ;;  %v343_v20 = vstv %s1031_s27  ;;  %v414_v21 = vstv %s1036_s9  ;;  %s726_s12 = scalar_lea.vmem %s1067_s7, 32  ;;  %s730_s27 = sshll.u32 %s801_s3, 4  ;;  %s731_s27 = int_to_ptr.vmem [resolvable:$false] %s730_s27 }
  0x65   : > { %v664_v10 = vpop.eup %663  ;;  %v300_v15 = vadd.f32 %v299_v7, %v285_v61  ;;  %v397_v17 = vadd.f32 %v396_v8, %v393_v63  ;;  %v411_v18 = vmul.f32 %v945_v1, %v410_v14  ;;  %673 = vtanh.f32 %v385_v11  ;;  %p727_p12 = scmp.ne.s32.totalorder %s1067_s7, %s726_s12  ;;  %s732_s9 = scalar_lea.vmem %s731_s27, 64 }
  0x66   : > { %v314_v16 = vmul.f32 %v664_v10, %v313_v3  ;;  %v666_v19 = vpop.eup %665  ;;  %v358_v0 = vstv %s1042_s13  ;;  %v373_v31 = vstv %s1048_s14  ;;  %v388_v36 = vstv %s574_s15  ;;  %p733_p9 = scmp.lt.s32.totalorder %s1067_s7, %s731_s27  ;;  %p734_p7 = scmp.lt.s32.totalorder %s732_s9, %s726_s12 }
  0x67   : > { %v329_v23 = vmul.f32 %v666_v19, %v328_v4  ;;  %v400_v24 = vadd.f32 %v399_v12, %v397_v17  ;;  %v412_v25 = vadd.f32 %v411_v18, %v408_v13  ;;  %v403_v40 = vstv %s578_s16  ;;  %p728_p3 = pnand %p727_p12, %p1125_p2 }
  0x68   : > { %v315_v22 = vadd.f32 %v314_v16, %v300_v15  ;;  %v668_v26 = vpop.eup %667  ;;  %v418_v43 = vstv %s582_s17  ;;  %v422_v49 = vlaneseq  ;;  %p735_p5 = por %p734_p7, %p733_p9 }
  0x69   : > { %675 = vtanh.f32 %v400_v24  ;;  %v415_v28 = vadd.f32 %v414_v21, %v412_v25  ;;  %v344_v29 = vmul.f32 %v668_v26, %v343_v20  ;;  %p729_p4 = pneg %p728_p3 }
  0x6a   : > { %v330_v27 = vadd.f32 %v329_v23, %v315_v22  ;;  %vm424_vm0 = vcmp.lt.s32.totalorder %v422_v49, 256 }
  0x6b   : > { %v670_v30 = vpop.eup %669  ;;  %677 = vtanh.f32 %v415_v28  ;;  %p736_p6 = pnand %p735_p5, %p729_p4 }
  0x6c   : > { %v345_v1 = vadd.f32 %v344_v29, %v330_v27  ;;  %v359_v32 = vmul.f32 %v670_v30, %v358_v0 }
  0x6d   : > { %v672_v33 = vpop.eup %671 }
  0x6e   : > { %v360_v34 = vadd.f32 %v359_v32, %v345_v1  ;;  %v374_v35 = vmul.f32 %v672_v33, %v373_v31 }
  0x6f   : > { %v674_v37 = vpop.eup %673 }
  0x70   : > { %v375_v38 = vadd.f32 %v374_v35, %v360_v34  ;;  %v389_v39 = vmul.f32 %v674_v37, %v388_v36 }
  0x72   : > { %v390_v42 = vadd.f32 %v389_v39, %v375_v38 }
  0x73   : > { %v676_v41 = vpop.eup %675 }
  0x74   : > { %v404_v44 = vmul.f32 %v676_v41, %v403_v40 }
  0x75   : > { %v678_v45 = vpop.eup %677 }
  0x76   : > { %v405_v46 = vadd.f32 %v404_v44, %v390_v42  ;;  %v419_v47 = vmul.f32 %v678_v45, %v418_v43 }
  0x78   : > { %v420_v48 = vadd.f32 %v419_v47, %v405_v46 }
  0x7a   : > { %679 = vtanh.f32 %v420_v48 }
  0x84   : > { %v680_v50 = vpop.eup %679 }
  0x85   : > { %426 = vst.msk [vmem:[%s258_s26] sm:$0x3] %vm424_vm0, %v680_v50 }
  0x86   : > { %739 = shalt.err (!%p736_p6)
}
  0x87   : > { %s740_s13 = scalar_lea.hbm %s1065_s10, 32  ;;  %s744_s16 = scalar_lea.hbm %s1112_s5, 128 }
  0x88   : > { %p741_p10 = scmp.ne.s32.totalorder %s1065_s10, %s740_s13  ;;  %p745_p11 = scmp.lt.u32.totalorder %s1065_s10, %s1112_s5 }
  0x89   : > { %p746_p13 = scmp.lt.u32.totalorder %s744_s16, %s740_s13  ;;  %p748_p12 = scmp.lt.u32.totalorder %s740_s13, %s1065_s10 }
  0x8a   : > { %p742_p8 = pnand %p741_p10, %p1125_p2 }
  0x8b   : > { %p747_p1 = por %p746_p13, %p745_p11 }
  0x8c   : > { %p743_p0 = pneg %p742_p8 }
  0x8d   : > { %p749_p3 = por %p748_p12, %p747_p1 }
  0x8f   : > { %p750_p4 = pnand %p749_p3, %p743_p0 }
  0x91   : > { %753 = shalt.err (!%p750_p4)
}
  0x92   : > { %601 = dma.vmem_to_hbm [thread:$0]  (%p1125_p2), %s1067_s7, 32, %s1065_s10, %s428_s11  }
  0x93 PF: > { %p623_p9 = scmp.ge.s32.totalorder %s796_s23, 2  ;;  %s454_s19 = sand.u32 1, %s784_s20  }
  0x94   : > { %p1126_p7 = scmp.ne.s32.totalorder %s1117_s30, 0  ;;  %s455_s24 = scalar_lea.sflag [#allocation4], %s454_s19 }
  0x96   : > { %p614_p5 = pnand %p623_p9, %p1126_p7 }
  0x98   : > { %779 = dma.done.wait (!%p614_p5), %s455_s24, 32  }
  0x99   : > { %781 = vsyncadd (!%p614_p5), %s455_s24, 4294967264  ;;  %p18_p6 = scmp.ge.s32.totalorder %s860_s25, 6   ;;  %s1127_s20 = smov %s788_s21 }
  0x9a   : > { %s1128_s21 = smov %s792_s22  ;;  %s1129_s22 = smov %s871_s28 }
  0x9b   : > { %s1130_s23 = smov %s860_s25  ;;  %20 = sbr.rel (!%p18_p6) target bundleno = 7 (0x7), region = 89 }
  0xa2   :  { %460 = vsyncpa [#allocation4], 1 }
  0xa3   :  { %462 = vsyncpa [#allocation4 + $0x1], 1 }
  0xa4   :  { %463 = vsyncpa [#allocation5], 1 }
  0xa5   :  { %465 = vsyncpa [#allocation5 + $0x1], 1 }
  0xa6   :  { %466 = vsyncpa [#allocation7], 1 }

</bundles_post_ra>
